<compile_context>
chip_gen: v6e
topology: v6e:2x2x1
jax: 0.10.0
libtpu: 0.0.40
codegen_flags: <defaults>
</compile_context>

<pallas_src>
import functools

import jax
import jax.numpy as jnp
from jax.experimental import pallas as pl
from jax.experimental.pallas import tpu as pltpu


def _mse_kernel(x_ref, y_ref, out_ref, acc_ref, *,
                inv_n, valid_rows, block_rows, mask_tail):
    """Streams (block_rows, 128) tiles, accumulates d*d elementwise in a VMEM
    vector accumulator, and does a single final reduce -> mean."""
    i = pl.program_id(0)

    @pl.when(i == 0)
    def _():
        acc_ref[...] = jnp.zeros_like(acc_ref)

    d = x_ref[...].astype(jnp.float32) - y_ref[...].astype(jnp.float32)
    sq = d * d
    if mask_tail:
        # Last grid block may read past the array; zero out rows >= valid_rows.
        row = jax.lax.broadcasted_iota(jnp.int32, sq.shape, 0) + i * block_rows
        sq = jnp.where(row < valid_rows, sq, 0.0)
    acc_ref[...] += sq  # pure VPU, hidden under the input DMA

    @pl.when(i == pl.num_programs(0) - 1)
    def _():
        out_ref[0, 0] = jnp.sum(acc_ref[...]) * inv_n


def pallas_mse(image, target):
    """mean((image - target)**2) computed on-TPU with a Pallas reduction kernel."""
    assert image.shape == target.shape
    x = image.reshape(-1)
    y = target.reshape(-1)
    n = x.shape[0]

    LANE = 128
    rem = n % LANE
    if rem:
        # Rare for GS image shapes (3*H*W with H*W a multiple of 128).  Padded
        # zeros contribute 0 to the squared-diff sum, so the mean (over n) is
        # unchanged.
        # TODO(synk): avoidable with in-kernel lane masking if this path ever
        # matters for HBM traffic.
        pad = LANE - rem
        x = jnp.pad(x, (0, pad))
        y = jnp.pad(y, (0, pad))
    rows = x.shape[0] // LANE
    # Contiguous reshape: metadata-only, no HBM copy.
    x = x.reshape(rows, LANE)
    y = y.reshape(rows, LANE)

    TARGET_ROWS = 2048  # 1 MiB f32 per input per step; 2 inputs x 2 bufs = 4 MiB
    if rows <= TARGET_ROWS:
        block_rows = rows            # single grid step, block == full array dims
    else:
        block_rows = TARGET_ROWS     # multiple of 8 -> (8,128)-aligned
    n_steps = pl.cdiv(rows, block_rows)
    mask_tail = (rows % block_rows) != 0

    kernel = functools.partial(
        _mse_kernel,
        inv_n=1.0 / float(n),
        valid_rows=rows,
        block_rows=block_rows,
        mask_tail=mask_tail,
    )

    # TODO(synk): on v7x a 2-TensorCore split of the reduction (leading
    # "parallel" grid axis with per-core partial sums) would ~halve streaming
    # time; kept single-core here for portability across v5e/v6e/v7x.
    out = pl.pallas_call(
        kernel,
        out_shape=jax.ShapeDtypeStruct((1, 1), jnp.float32),
        grid_spec=pltpu.PrefetchScalarGridSpec(
            num_scalar_prefetch=0,
            grid=(n_steps,),
            in_specs=[
                pl.BlockSpec((block_rows, LANE), lambda i: (i, 0)),
                pl.BlockSpec((block_rows, LANE), lambda i: (i, 0)),
            ],
            out_specs=pl.BlockSpec(memory_space=pltpu.SMEM),
            scratch_shapes=[pltpu.VMEM((block_rows, LANE), jnp.float32)],
        ),
        compiler_params=pltpu.CompilerParams(
            dimension_semantics=("arbitrary",),   # reduction axis, scratch-carried
            vmem_limit_bytes=32 * 1024 * 1024,
        ),
    )(x, y)
    return out[0, 0]


class NetworkWrapperJAX:
    """JAX/Pallas analogue of lib/train/losses/gs.NetworkWrapper."""

    def __init__(self, white_background=False):
        # bg color tensor from __init__ (unused by the loss math itself)
        bg_color = [1.0, 1.0, 1.0] if white_background else [0.0, 0.0, 0.0]
        self.bg = jnp.asarray(bg_color, dtype=jnp.float32)
        self.img2mse = pallas_mse
        self.mse2psnr = lambda m: -10.0 * jnp.log(m) / jnp.log(10.0)

    def forward(self, batch):
        # TODO(synk): render.render (Gaussian-splatting CUDA rasterizer) has no
        # Pallas equivalent; use the precomputed synthetic rendered image.
        render_pkg = {
            "render": batch["rendered_image"],
            "viewspace_points": jnp.zeros((1, 3), jnp.float32),
            "visibility_filter": jnp.zeros((1,), jnp.bool_),
            "radii": jnp.zeros((1,), jnp.float32),
        }
        image = render_pkg["render"]

        scalar_stats = {}
        loss = jnp.float32(0.0)
        img_loss = self.img2mse(image, batch["original_image"])
        scalar_stats["img_loss"] = img_loss
        loss = loss + img_loss
        # (image saving every 1000 iterations is host I/O, skipped)
        scalar_stats["loss"] = loss
        image_stats = {}
        return render_pkg, loss, scalar_stats, image_stats


if __name__ == "__main__":
    key = jax.random.PRNGKey(0)
    k1, k2 = jax.random.split(key)

    C, H, W = 3, 16, 16  # CHW, matching GS render output convention
    rendered = jax.random.uniform(k1, (C, H, W), dtype=jnp.float32)
    original = jax.random.uniform(k2, (C, H, W), dtype=jnp.float32)

    batch = {
        "step": 1,
        "rendered_image": rendered,
        "original_image": original,
    }

    wrapper = NetworkWrapperJAX(white_background=False)
    render_pkg, loss, scalar_stats, image_stats = wrapper.forward(batch)
    loss = jax.block_until_ready(loss)

    # sanity check against plain-JAX reference
    ref = jnp.mean((rendered - original) ** 2)
    assert jnp.allclose(loss, ref, rtol=1e-6, atol=1e-6), (loss, ref)

    print("KERNEL_OK")
</pallas_src>

<mosaic_0001>
module attributes {stable_mosaic.version = 11 : i64} {
  func.func @_mse_kernel(%arg0: i32, %arg1: memref<6x128xf32, #tpu.memory_space<vmem>>, %arg2: memref<6x128xf32, #tpu.memory_space<vmem>>, %arg3: memref<1x1xf32, #tpu.memory_space<smem>>, %arg4: memref<6x128xf32, #tpu.memory_space<vmem>>) attributes {dimension_semantics = [#tpu.dimension_semantics<arbitrary>], iteration_bounds = array<i64: 1>, scalar_prefetch = 0 : i64, scratch_operands = 1 : i64, tpu.core_type = #tpu.core_type<tc>, window_params = [{transform_indices = @transform_0, window_bounds = array<i64: 6, 128>}, {transform_indices = @transform_1, window_bounds = array<i64: 6, 128>}, {transform_indices = @transform_2, window_bounds = array<i64: 1, 1>}]} {
    %c0_i32 = arith.constant 0 : i32
    %0 = arith.cmpi eq, %arg0, %c0_i32 : i32
    %1 = arith.extui %0 : i1 to i32
    %c0_i32_0 = arith.constant 0 : i32
    %2 = arith.cmpi ne, %1, %c0_i32_0 : i32
    scf.if %2 {
      %cst = arith.constant 0.000000e+00 : f32
      %13 = vector.broadcast %cst : f32 to vector<6x128xf32>
      %c0_10 = arith.constant 0 : index
      %c0_11 = arith.constant 0 : index
      %14 = vector.load %arg4[%c0_10, %c0_11] : memref<6x128xf32, #tpu.memory_space<vmem>>, vector<6x128xf32>
      tpu.vector_store %arg4[%c0_10, %c0_11], %13 {strides = array<i32>} : memref<6x128xf32, #tpu.memory_space<vmem>>, vector<6x128xf32>,
    } else {
    }
    %c0 = arith.constant 0 : index
    %c0_1 = arith.constant 0 : index
    %3 = vector.load %arg1[%c0, %c0_1] : memref<6x128xf32, #tpu.memory_space<vmem>>, vector<6x128xf32>
    %c0_2 = arith.constant 0 : index
    %c0_3 = arith.constant 0 : index
    %4 = vector.load %arg2[%c0_2, %c0_3] : memref<6x128xf32, #tpu.memory_space<vmem>>, vector<6x128xf32>
    %5 = arith.subf %3, %4 : vector<6x128xf32>
    %6 = arith.mulf %5, %5 : vector<6x128xf32>
    %c0_4 = arith.constant 0 : index
    %c0_5 = arith.constant 0 : index
    %7 = vector.load %arg4[%c0_4, %c0_5] : memref<6x128xf32, #tpu.memory_space<vmem>>, vector<6x128xf32>
    %8 = arith.addf %7, %6 : vector<6x128xf32>
    %c0_6 = arith.constant 0 : index
    %c0_7 = arith.constant 0 : index
    %9 = vector.load %arg4[%c0_6, %c0_7] : memref<6x128xf32, #tpu.memory_space<vmem>>, vector<6x128xf32>
    tpu.vector_store %arg4[%c0_6, %c0_7], %8 {strides = array<i32>} : memref<6x128xf32, #tpu.memory_space<vmem>>, vector<6x128xf32>,
    %c0_i32_8 = arith.constant 0 : i32
    %10 = arith.cmpi eq, %arg0, %c0_i32_8 : i32
    %11 = arith.extui %10 : i1 to i32
    %c0_i32_9 = arith.constant 0 : i32
    %12 = arith.cmpi ne, %11, %c0_i32_9 : i32
    scf.if %12 {
      %c0_10 = arith.constant 0 : index
      %c0_11 = arith.constant 0 : index
      %13 = vector.load %arg4[%c0_10, %c0_11] : memref<6x128xf32, #tpu.memory_space<vmem>>, vector<6x128xf32>
      %14 = vector.shape_cast %13 : vector<6x128xf32> to vector<1x6x128xf32>
      %cst = arith.constant dense<0.000000e+00> : vector<1xf32>
      %15 = vector.multi_reduction <add>, %14, %cst [1, 2] : vector<1x6x128xf32> to vector<1xf32>
      %16 = vector.shape_cast %15 : vector<1xf32> to vector<1x1x1xf32>
      %17 = vector.extract %16[0, 0, 0] : f32 from vector<1x1x1xf32>
      %cst_12 = arith.constant 0.00130208337 : f32
      %18 = arith.mulf %17, %cst_12 : f32
      %c0_13 = arith.constant 0 : index
      %c0_14 = arith.constant 0 : index
      %19 = memref.load %arg3[%c0_13, %c0_14] : memref<1x1xf32, #tpu.memory_space<smem>>
      memref.store %18, %arg3[%c0_13, %c0_14] : memref<1x1xf32, #tpu.memory_space<smem>>
    } else {
    }
    return
  }
  func.func @transform_0(%arg0: i32) -> (i32, i32) {
    %c0_i32 = arith.constant 0 : i32
    %c0_i32_0 = arith.constant 0 : i32
    return %arg0, %c0_i32 : i32, i32
  }
  func.func @transform_1(%arg0: i32) -> (i32, i32) {
    %c0_i32 = arith.constant 0 : i32
    %c0_i32_0 = arith.constant 0 : i32
    return %arg0, %c0_i32 : i32, i32
  }
  func.func @transform_2(%arg0: i32) -> (i32, i32) {
    %c0_i32 = arith.constant 0 : i32
    %c0_i32_0 = arith.constant 0 : i32
    %c0_i32_1 = arith.constant 0 : i32
    return %c0_i32, %c0_i32_0 : i32, i32
  }
}

</mosaic_0001>

<bundles_post_ra>
// kernel: tpu_custom_call.1
= control target key start
LH: loop header
LB: loop body
LE: loop exit
PB: predicated region body
PF: predicated region fallthrough
CT: control target
= control target key end

     0   :  { %7 = vsyncpa [#allocation4], 0  ;;  %s169_s0 = inlined_call_operand.hbm [shape: f32[6,128], index: 0, kind: input, shape index: {}]   ;;  %s170_s1 = inlined_call_operand.hbm [shape: f32[6,128], index: 1, kind: input, shape index: {}]   ;;  %s171_s2 = inlined_call_operand.hbm [shape: f32[1,1], index: 2, kind: output, shape index: {}]  }
   0x1   :  { %8 = vsyncpa [#allocation7], 0 }
   0x2   :  { %9 = vsyncpa [#allocation5], 0  ;;  %s141_s9 = smov [#allocation3]   ;;  %s142_s11 = smov [#allocation6]  }
   0x3   :  { %s16_s10 = sshll.u32 %s141_s9, 4  ;;  %s26_s12 = sshll.u32 %s142_s11, 4  ;;  %s17_s10 = int_to_ptr.vmem [resolvable:$true] %s16_s10  ;;  %s27_s12 = int_to_ptr.vmem [resolvable:$true] %s26_s12 }
   0x4   :  { %s95_s13 = scalar_lea.vmem %s17_s10, 128  ;;  %p100_p1 = scmp.lt.s32.totalorder %s17_s10, %s17_s10 }
   0x5   :  { %p96_p0 = scmp.ne.s32.totalorder %s17_s10, %s95_s13  ;;  %p101_p2 = scmp.lt.s32.totalorder %s95_s13, %s95_s13 }
   0x7   :  { %p102_p3 = por %p101_p2, %p100_p1 }
   0x9   :  { %p103_p4 = pnand %p102_p3, %p96_p0 }
   0xb   :  { %106 = shalt.err (!%p103_p4)
}
   0xc   :  { %19 = dma.hbm_to_vmem [thread:$0]  %s169_s0, 128, %s17_s10, [#allocation4]  }
   0xd   :  { %s115_s16 = scalar_lea.vmem %s27_s12, 128  ;;  %p120_p6 = scmp.lt.s32.totalorder %s27_s12, %s27_s12 }
   0xe   :  { %p116_p5 = scmp.ne.s32.totalorder %s27_s12, %s115_s16  ;;  %p121_p7 = scmp.lt.s32.totalorder %s115_s16, %s115_s16 }
  0x10   :  { %p122_p8 = por %p121_p7, %p120_p6 }
  0x12   :  { %p123_p9 = pnand %p122_p8, %p116_p5 }
  0x14   :  { %126 = shalt.err (!%p123_p9)
}
  0x15   :  { %29 = dma.hbm_to_vmem [thread:$0]  %s170_s1, 128, %s27_s12, [#allocation7]  }
  0x16   :  { %135 = dma.done.wait [#allocation4], 128  }
  0x17   :  { %136 = vsyncadd [#allocation4], 4294967168 }
  0x18   :  { %137 = dma.done.wait [#allocation7], 128  }
  0x19   :  { %138 = vsyncadd [#allocation7], 4294967168  ;;  %v143_v0 = vmov 0.0   ;;  %v41_v1 = vld [vmem:[#allocation3] sm:$0x3f]  ;;  %vm52_vm0 = vcmask 1045504  }
  0x1a   :  { %40 = vst [vmem:[#allocation2] sm:$0x3f] %v143_v0  ;;  %v42_v2 = vld [vmem:[#allocation6] sm:$0x3f]  ;;  %s144_s19 = smov [#allocation8]  }
  0x1b   :  { %v43_v3 = vsub.f32 %v41_v1, %v42_v2 }
  0x1d   :  { %v44_v5 = vmul.f32 %v43_v3, %v43_v3 }
  0x21   :  { %v45_v4 = vld [vmem:[#allocation2] sm:$0x3f] }
  0x22   :  { %v46_v6 = vadd.f32 %v45_v4, %v44_v5 }
  0x24   :  { %47 = vst [vmem:[#allocation2] sm:$0x3f] %v46_v6 }
  0x2b   :  { %v51_v7 = vld [vmem:[#allocation2] sm:$0x3f] }
  0x2c   :  { %v53_v8 = vsel %vm52_vm0, %v51_v7, 0.0 }
  0x2d   :  { %54 = vadd.xlane.f32.xlu0 %v53_v8 }
  0xb6   :  { %v55_v9 = vpop.xlane.xlu0 %54 }
  0xb7   :  { %v56_v10 = vrot.slane %v55_v9, 4 }
  0xb9   :  { %v57_v11 = vadd.f32 %v56_v10, %v55_v9 }
  0xbb   :  { %v58_v12 = vrot.slane %v57_v11, 2 }
  0xbd   :  { %v59_v13 = vadd.f32 %v58_v12, %v57_v11 }
  0xbf   :  { %v60_v14 = vrot.slane %v59_v13, 1 }
  0xc1   :  { %v61_v15 = vadd.f32 %v60_v14, %v59_v13 }
  0xc3   :  { %81 = vpush %v61_v15 }
  0xf4   :  { %s82_s0 = spop %81 }
  0xf5   :  { %s63_s1 = smul.f32 0.0013020834, %s82_s0 }
  0xf7   :  { %65 = sst [smem:[#allocation8]] %s63_s1 }
  0xf8   :  { %73 = dma.smem_to_hbm %s144_s19, 16, %s171_s2, [#allocation5]  }
  0xf9   :  { %139 = dma.done.wait [#allocation5], 16  }
  0xfa   :  { %140 = vsyncadd [#allocation5], 4294967280 }
  0xfb   :  { %77 = sfence }
  0xfc   :  { %78 = vsyncpa [#allocation4], 1 }
  0xfd   :  { %79 = vsyncpa [#allocation7], 1 }
  0xfe   :  { %80 = vsyncpa [#allocation5], 1 }

</bundles_post_ra>
